<compile_context>
chip_gen: v7x
topology: tpu7x:2x2x1
jax: 0.10.0
libtpu: 0.0.40
codegen_flags: <defaults>
</compile_context>

<pallas_src>
import functools

import jax
import jax.numpy as jnp
from jax.experimental import pallas as pl
from jax.experimental.pallas import tpu as pltpu


# ----------------------------------------------------------------------------
# Tile selection
# ----------------------------------------------------------------------------

_MAX_TM = 512    # M-tile cap: big M tiles minimize W re-reads
_MAX_TN = 1024   # N-tile cap: big, lane-dense N tiles minimize x re-reads
_MAX_TK = 1024   # K <= this: keep the whole reduction in one block


def _round_up(x, m):
    return ((x + m - 1) // m) * m


def _select_m_tile(B):
    """Returns (tm, Bp). Block equals the full dim when small -> no padding."""
    if B <= _MAX_TM:
        return B, B
    for tm in (512, 384, 256, 128):
        if B % tm == 0:
            return tm, B
    return 256, _round_up(B, 256)


def _select_n_tile(N):
    """Returns (tn, Np). N is padded to a 128 multiple (lane-dense stores)."""
    if N <= _MAX_TN:
        Np = max(_round_up(N, 128), 128)
        return Np, Np
    for tn in (1024, 896, 768, 640, 512, 384, 256, 128):
        if N % tn == 0:
            return tn, N
    return 512, _round_up(N, 512)


def _select_k_tile(K, prefer_large=False):
    """Returns (tk, Kp).

    K padding with zeros is safe for the reduction.  For normal shapes a
    tk near 512 is preferred (HBM traffic does not depend on tk); for
    skinny-batch weight-streaming (prefer_large) a larger tk is preferred so
    weight DMAs are bigger.  Kp is identical in both orderings.
    """
    if K <= _MAX_TK:
        return K, K
    candidates = range(2048, 511, -128) if prefer_large else range(512, 2049, 128)
    for tk in candidates:
        if K % tk == 0:
            return tk, K
    return 512, _round_up(K, 512)


# ----------------------------------------------------------------------------
# Chip info (trace-time; conservative fallbacks)
# ----------------------------------------------------------------------------

def _chip_info():
    """Returns (physical VMEM bytes per core, TensorCores per chip)."""
    vmem_bytes = 64 << 20        # smallest current per-TC VMEM (v7x)
    tc_per_chip = 1              # conservative: no megacore split
    try:
        vmem_bytes = int(pltpu.get_tpu_info().vmem_capacity_bytes)
    except Exception:
        pass
    try:
        kind = jax.devices()[0].device_kind.lower()
        if any(t in kind for t in ("v5 lite", "v5e", "v6")):
            tc_per_chip = 1
        elif any(t in kind for t in ("v3", "v4", "v5p", "7")):
            tc_per_chip = 2
    except Exception:
        pass
    return vmem_bytes, tc_per_chip


# ----------------------------------------------------------------------------
# Kernels
# ----------------------------------------------------------------------------

def _linrelu_kernel_f32(x_ref, wt_ref, b_ref, o_ref):
    """f32 output: accumulate directly into the resident output block.

    x_ref : (tm, tk) tile of x
    wt_ref: (tk, tn) tile of W^T
    b_ref : (1, tn)  tile of bias (f32)
    o_ref : (tm, tn) f32 output tile (VMEM-resident across k)
    """
    k = pl.program_id(2)

    @pl.when(k == 0)
    def _():
        # Fold the bias into the accumulator init (no epilogue add needed).
        o_ref[...] = jnp.broadcast_to(b_ref[...], o_ref.shape).astype(jnp.float32)

    o_ref[...] += jnp.dot(
        x_ref[...], wt_ref[...], preferred_element_type=jnp.float32
    )

    @pl.when(k == pl.num_programs(2) - 1)
    def _():
        o_ref[...] = jnp.maximum(o_ref[...], 0.0)


def _linrelu_kernel_acc(x_ref, wt_ref, b_ref, o_ref, acc_ref):
    """Non-f32 output: keep a separate f32 accumulator scratch."""
    k = pl.program_id(2)

    @pl.when(k == 0)
    def _():
        acc_ref[...] = jnp.broadcast_to(b_ref[...], acc_ref.shape).astype(jnp.float32)

    acc_ref[...] += jnp.dot(
        x_ref[...], wt_ref[...], preferred_element_type=jnp.float32
    )

    @pl.when(k == pl.num_programs(2) - 1)
    def _():
        o_ref[...] = jnp.maximum(acc_ref[...], 0.0).astype(o_ref.dtype)


# ----------------------------------------------------------------------------
# Parameter preparation (one-time, outside the hot path)
# ----------------------------------------------------------------------------

def prepare_linrelu_params(weight, bias, *, compute_dtype=None):
    """One-time relayout of PyTorch-style Linear params for the kernel.

    weight: [out_features, in_features], bias: [out_features].
    Returns (wt_p, b_p): wt_p is W^T padded to [Kp, Np]; b_p is f32 [1, Np].
    Cache these next to the params so the per-call hot path never re-does the
    transpose / pad.  compute_dtype=jnp.bfloat16 enables bf16 MXU compute
    (f32 accumulation kept; not bit-exact vs an f32 reference).
    """
    out_features, in_features = weight.shape
    _, Kp = _select_k_tile(in_features)
    _, Np = _select_n_tile(out_features)

    wt = weight.T
    if compute_dtype is not None:
        wt = wt.astype(compute_dtype)

    if (Kp, Np) != (in_features, out_features):
        wt_p = jnp.zeros((Kp, Np), wt.dtype).at[:in_features, :out_features].set(wt)
        b_p = (
            jnp.zeros((1, Np), jnp.float32)
            .at[0, :out_features]
            .set(bias.astype(jnp.float32))
        )
    else:
        wt_p = wt
        b_p = bias.astype(jnp.float32).reshape(1, Np)
    return wt_p, b_p


# ----------------------------------------------------------------------------
# Hot path
# ----------------------------------------------------------------------------

def _make_weight_spec(tk, tn, depth):
    """W^T BlockSpec; asks for depth-3 pipelining when supported (skinny B)."""
    index_map = lambda i, j, k: (k, j)
    if depth > 2 and hasattr(pl, "Buffered"):
        try:
            return pl.BlockSpec((tk, tn), index_map, pipeline_mode=pl.Buffered(depth))
        except TypeError:  # older jax without pipeline_mode kwarg
            pass
    return pl.BlockSpec((tk, tn), index_map)


@functools.partial(jax.jit, static_argnames=("out_features",))
def linrelu_apply(x, wt_p, b_p, *, out_features):
    """y = relu(x @ W^T + b) with pre-prepared weights.

    x:    [B, in_features]
    wt_p: [Kp, Np]  (from prepare_linrelu_params)
    b_p:  [1, Np]   (f32, from prepare_linrelu_params)
    """
    B, K = x.shape
    Kp, Np = wt_p.shape
    out_dtype = x.dtype

    vmem_physical, tc_per_chip = _chip_info()

    tm, Bp = _select_m_tile(B)
    tk, Kp_exp = _select_k_tile(K, prefer_large=(B <= 128))
    tn, Np_exp = _select_n_tile(out_features)
    assert (Kp, Np) == (Kp_exp, Np_exp), (
        "wt_p/b_p were not produced by prepare_linrelu_params for these shapes"
    )

    compute_dtype = wt_p.dtype
    m_align = 16 if jnp.dtype(compute_dtype).itemsize < 4 else 8

    grid_m, grid_n = Bp // tm, Np // tn
    grid_k = Kp // tk

    # Megacore: only on chips with 2 TensorCores, and only when the parallel
    # (M, N) block count is odd (including 1) and a split keeps alignment.
    if tc_per_chip >= 2 and (grid_m * grid_n) % 2 == 1:
        if tn % 256 == 0:
            tn //= 2
            grid_n *= 2
        elif tm % (2 * m_align) == 0:
            tm //= 2
            grid_m *= 2

    in_item = jnp.dtype(compute_dtype).itemsize
    w_item = jnp.dtype(compute_dtype).itemsize
    out_item = jnp.dtype(out_dtype).itemsize
    acc_needed = out_dtype != jnp.float32

    # Deeper weight buffering when the kernel is pure weight-streaming.
    w_bufs = 3 if (grid_m == 1 and grid_k >= 3) else 2

    def _vmem_need(tm_, tn_, tk_, w_bufs_):
        acc = tm_ * tn_ * 4 if acc_needed else 0
        return (2 * tm_ * tk_ * in_item
                + w_bufs_ * tk_ * tn_ * w_item
                + 2 * tm_ * tn_ * out_item
                + acc + 2 * tn_ * 4)

    # ~75% of physical VMEM: ~48 MiB on v7x (64 MiB/TC), ~96 MiB on v5e/v6e.
    budget = min((vmem_physical * 3) // 4, 100 << 20)
    if w_bufs == 3 and _vmem_need(tm, tn, tk, 3) > budget:
        w_bufs = 2
    # Shrink tiles if over budget (rarely triggers with the caps above).
    while _vmem_need(tm, tn, tk, w_bufs) > budget:
        if tk > 512 and tk % 256 == 0:
            tk //= 2
            grid_k *= 2
        elif tn > 128 and tn % 256 == 0:
            tn //= 2
            grid_n *= 2
        elif tm > m_align and tm % (2 * m_align) == 0:
            tm //= 2
            grid_m *= 2
        else:
            break

    grid = (grid_m, grid_n, grid_k)

    # Cast x to the (possibly bf16) compute dtype; pad only when required.
    xp = x if x.dtype == compute_dtype else x.astype(compute_dtype)
    if (Bp, Kp) != (B, K):
        xp = jnp.zeros((Bp, Kp), xp.dtype).at[:B, :K].set(xp)

    if acc_needed:
        kernel = _linrelu_kernel_acc
        scratch_shapes = [pltpu.VMEM((tm, tn), jnp.float32)]
    else:
        kernel = _linrelu_kernel_f32
        scratch_shapes = []

    vmem_limit = int(min(max(_vmem_need(tm, tn, tk, w_bufs) + (4 << 20), 16 << 20),
                         budget))

    # HBM traffic including operand re-fetch factors.
    cost = pl.CostEstimate(
        flops=2 * Bp * Kp * Np,
        transcendentals=0,
        bytes_accessed=(Bp * Kp * in_item * grid_n
                        + Kp * Np * w_item * grid_m
                        + Bp * Np * out_item),
    )

    out = pl.pallas_call(
        kernel,
        out_shape=jax.ShapeDtypeStruct((Bp, Np), out_dtype),
        grid_spec=pltpu.PrefetchScalarGridSpec(
            num_scalar_prefetch=0,
            grid=grid,
            in_specs=[
                pl.BlockSpec((tm, tk), lambda i, j, k: (i, k)),   # x tile
                _make_weight_spec(tk, tn, w_bufs),                # W^T tile
                pl.BlockSpec((1, tn), lambda i, j, k: (0, j)),    # bias tile
            ],
            out_specs=pl.BlockSpec((tm, tn), lambda i, j, k: (i, j)),
            scratch_shapes=scratch_shapes,
        ),
        compiler_params=pltpu.CompilerParams(
            dimension_semantics=("parallel", "parallel", "arbitrary"),
            vmem_limit_bytes=vmem_limit,
        ),
        cost_estimate=cost,
    )(xp, wt_p, b_p)

    if (Bp, Np) != (B, out_features):
        out = out[:B, :out_features]
    return out


def linrelu(x, weight, bias, *, compute_dtype=None):
    """Convenience wrapper: y = relu(x @ weight.T + bias).

    For repeated calls, run prepare_linrelu_params once (optionally with
    compute_dtype=jnp.bfloat16 for ~2x MXU/HBM savings at bf16 tolerance) and
    call linrelu_apply directly so the weight relayout is not paid per call.
    """
    wt_p, b_p = prepare_linrelu_params(weight, bias, compute_dtype=compute_dtype)
    return linrelu_apply(x, wt_p, b_p, out_features=weight.shape[0])


# ----------------------------------------------------------------------------
# Init (matches torch.nn.Linear default) + demo
# ----------------------------------------------------------------------------

def init_linrelu_params(key, in_size, out_size, dtype=jnp.float32):
    """weight, bias ~ U(-1/sqrt(in_size), 1/sqrt(in_size))."""
    kw, kb = jax.random.split(key)
    bound = 1.0 / (in_size ** 0.5)
    weight = jax.random.uniform(
        kw, (out_size, in_size), dtype=dtype, minval=-bound, maxval=bound
    )
    bias = jax.random.uniform(
        kb, (out_size,), dtype=dtype, minval=-bound, maxval=bound
    )
    return weight, bias


if __name__ == "__main__":
    key = jax.random.PRNGKey(0)
    k_x, k_p = jax.random.split(key)

    batch, in_size, out_size = 8, 32, 64
    x = jax.random.normal(k_x, (batch, in_size), dtype=jnp.float32)
    weight, bias = init_linrelu_params(k_p, in_size, out_size)

    y_ref = jnp.maximum(x @ weight.T + bias, 0.0)

    # f32 path (default; matches the f32 PyTorch module semantics).
    wt_p, b_p = prepare_linrelu_params(weight, bias)
    y = linrelu_apply(x, wt_p, b_p, out_features=out_size)
    jax.block_until_ready(y)
    assert y.shape == (batch, out_size)
    assert jnp.allclose(y, y_ref, atol=1e-5, rtol=1e-5), "f32 mismatch vs reference"

    # Optional bf16-compute path (f32 accumulation; looser tolerance).
    wt_bf, b_bf = prepare_linrelu_params(weight, bias, compute_dtype=jnp.bfloat16)
    y_bf = linrelu_apply(x, wt_bf, b_bf, out_features=out_size)
    jax.block_until_ready(y_bf)
    assert jnp.allclose(y_bf, y_ref, atol=5e-2, rtol=5e-2), "bf16 mismatch vs reference"

    print("KERNEL_OK")
</pallas_src>

<mosaic_0001>
module attributes {stable_mosaic.version = 11 : i64} {
  func.func @_linrelu_kernel_f32(%arg0: i32, %arg1: i32, %arg2: i32, %arg3: memref<8x32xf32, #tpu.memory_space<vmem>>, %arg4: memref<32x128xf32, #tpu.memory_space<vmem>>, %arg5: memref<1x128xf32, #tpu.memory_space<vmem>>, %arg6: memref<8x128xf32, #tpu.memory_space<vmem>>) attributes {dimension_semantics = [#tpu.dimension_semantics<parallel>, #tpu.dimension_semantics<parallel>, #tpu.dimension_semantics<arbitrary>], iteration_bounds = array<i64: 1, 1, 1>, scalar_prefetch = 0 : i64, scratch_operands = 0 : i64, tpu.core_type = #tpu.core_type<tc>, window_params = [{transform_indices = @transform_0, window_bounds = array<i64: 8, 32>}, {transform_indices = @transform_1, window_bounds = array<i64: 32, 128>}, {transform_indices = @transform_2, window_bounds = array<i64: 1, 128>}, {transform_indices = @transform_3, window_bounds = array<i64: 8, 128>}]} {
    %c0_i32 = arith.constant 0 : i32
    %0 = arith.cmpi eq, %arg2, %c0_i32 : i32
    %1 = arith.extui %0 : i1 to i32
    %c0_i32_0 = arith.constant 0 : i32
    %2 = arith.cmpi ne, %1, %c0_i32_0 : i32
    scf.if %2 {
      %c0_10 = arith.constant 0 : index
      %c0_11 = arith.constant 0 : index
      %12 = vector.load %arg5[%c0_10, %c0_11] : memref<1x128xf32, #tpu.memory_space<vmem>>, vector<1x128xf32>
      %13 = vector.shape_cast %12 : vector<1x128xf32> to vector<1x128xf32>
      %14 = vector.broadcast %13 : vector<1x128xf32> to vector<8x128xf32>
      %c0_12 = arith.constant 0 : index
      %c0_13 = arith.constant 0 : index
      %15 = vector.load %arg6[%c0_12, %c0_13] : memref<8x128xf32, #tpu.memory_space<vmem>>, vector<8x128xf32>
      tpu.vector_store %arg6[%c0_12, %c0_13], %14 {strides = array<i32>} : memref<8x128xf32, #tpu.memory_space<vmem>>, vector<8x128xf32>,
    } else {
    }
    %c0 = arith.constant 0 : index
    %c0_1 = arith.constant 0 : index
    %3 = vector.load %arg6[%c0, %c0_1] : memref<8x128xf32, #tpu.memory_space<vmem>>, vector<8x128xf32>
    %c0_2 = arith.constant 0 : index
    %c0_3 = arith.constant 0 : index
    %4 = vector.load %arg3[%c0_2, %c0_3] : memref<8x32xf32, #tpu.memory_space<vmem>>, vector<8x32xf32>
    %c0_4 = arith.constant 0 : index
    %c0_5 = arith.constant 0 : index
    %5 = vector.load %arg4[%c0_4, %c0_5] : memref<32x128xf32, #tpu.memory_space<vmem>>, vector<32x128xf32>
    %cst = arith.constant dense<0.000000e+00> : vector<8x128xf32>
    %6 = tpu.matmul %4, %5, %cst {dimension_numbers = #tpu.dot_dimension_numbers<[1], [0], [0], [1], [0, 0, 1, 1], [], []>} : vector<8x32xf32>, vector<32x128xf32>, vector<8x128xf32> -> vector<8x128xf32>
    %7 = arith.addf %3, %6 : vector<8x128xf32>
    %c0_6 = arith.constant 0 : index
    %c0_7 = arith.constant 0 : index
    %8 = vector.load %arg6[%c0_6, %c0_7] : memref<8x128xf32, #tpu.memory_space<vmem>>, vector<8x128xf32>
    tpu.vector_store %arg6[%c0_6, %c0_7], %7 {strides = array<i32>} : memref<8x128xf32, #tpu.memory_space<vmem>>, vector<8x128xf32>,
    %c0_i32_8 = arith.constant 0 : i32
    %9 = arith.cmpi eq, %arg2, %c0_i32_8 : i32
    %10 = arith.extui %9 : i1 to i32
    %c0_i32_9 = arith.constant 0 : i32
    %11 = arith.cmpi ne, %10, %c0_i32_9 : i32
    scf.if %11 {
      %c0_10 = arith.constant 0 : index
      %c0_11 = arith.constant 0 : index
      %12 = vector.load %arg6[%c0_10, %c0_11] : memref<8x128xf32, #tpu.memory_space<vmem>>, vector<8x128xf32>
      %cst_12 = arith.constant 0.000000e+00 : f32
      %13 = vector.broadcast %cst_12 : f32 to vector<8x128xf32>
      %14 = arith.maximumf %12, %13 : vector<8x128xf32>
      %c0_13 = arith.constant 0 : index
      %c0_14 = arith.constant 0 : index
      %15 = vector.load %arg6[%c0_13, %c0_14] : memref<8x128xf32, #tpu.memory_space<vmem>>, vector<8x128xf32>
      tpu.vector_store %arg6[%c0_13, %c0_14], %14 {strides = array<i32>} : memref<8x128xf32, #tpu.memory_space<vmem>>, vector<8x128xf32>,
    } else {
    }
    return
  }
  func.func @transform_0(%arg0: i32, %arg1: i32, %arg2: i32) -> (i32, i32) {
    %c0_i32 = arith.constant 0 : i32
    return %arg0, %arg2 : i32, i32
  }
  func.func @transform_1(%arg0: i32, %arg1: i32, %arg2: i32) -> (i32, i32) {
    %c0_i32 = arith.constant 0 : i32
    return %arg2, %arg1 : i32, i32
  }
  func.func @transform_2(%arg0: i32, %arg1: i32, %arg2: i32) -> (i32, i32) {
    %c0_i32 = arith.constant 0 : i32
    %c0_i32_0 = arith.constant 0 : i32
    return %c0_i32, %arg1 : i32, i32
  }
  func.func @transform_3(%arg0: i32, %arg1: i32, %arg2: i32) -> (i32, i32) {
    %c0_i32 = arith.constant 0 : i32
    return %arg0, %arg1 : i32, i32
  }
}

</mosaic_0001>

<bundles_post_ra>
// kernel: linrelu_apply.1
= control target key start
LH: loop header
LB: loop body
LE: loop exit
PB: predicated region body
PF: predicated region fallthrough
CT: control target
= control target key end

     0   :  { %8 = vsyncpa [#allocation3], 0  ;;  %s335_s0 = inlined_call_operand.hbm [shape: f32[8,32], index: 0, kind: input, shape index: {}]   ;;  %s336_s1 = inlined_call_operand.hbm [shape: f32[32,128], index: 1, kind: input, shape index: {}]   ;;  %s337_s2 = inlined_call_operand.vmem [shape: f32[1,128], index: 2, kind: input, shape index: {}]   ;;  %s338_s3 = inlined_call_operand.hbm [shape: f32[8,128], index: 3, kind: output, shape index: {}]  }
   0x1   :  { %9 = vsyncpa [#allocation6], 0 }
   0x2   :  { %10 = vsyncpa [#allocation4], 0  ;;  %s261_s12 = smov [#allocation2]   ;;  %s262_s14 = smov [#allocation5]  }
   0x3   :  { %s17_s13 = sshll.u32 %s261_s12, 4  ;;  %s26_s15 = sshll.u32 %s262_s14, 4  ;;  %s18_s13 = int_to_ptr.vmem [resolvable:$true] %s17_s13  ;;  %s289_s15 = int_to_ptr.vmem [resolvable:$true] %s26_s15 }
   0x4   :  { %s189_s18 = scalar_lea.hbm %s335_s0, 128 }
   0x5   :  { %p190_p0 = scmp.ne.s32.totalorder %s335_s0, %s189_s18  ;;  %p193_p1 = scmp.lt.u32.totalorder %s189_s18, %s335_s0 }
   0x7   :  { %p195_p2 = pnand %p193_p1, %p190_p0 }
   0x9   :  { %198 = shalt.err (!%p195_p2)
}
   0xa   :  { %s199_s23 = scalar_lea.vmem %s18_s13, 128  ;;  %p204_p4 = scmp.lt.s32.totalorder %s18_s13, %s18_s13 }
   0xb   :  { %p200_p3 = scmp.ne.s32.totalorder %s18_s13, %s199_s23  ;;  %p205_p5 = scmp.lt.s32.totalorder %s199_s23, %s199_s23 }
   0xd   :  { %p206_p6 = por %p205_p5, %p204_p4 }
   0xf   :  { %p207_p7 = pnand %p206_p6, %p200_p3 }
  0x11   :  { %210 = shalt.err (!%p207_p7)
}
  0x12   :  { %20 = dma.hbm_to_vmem [thread:$0]  %s335_s0, 128, %s18_s13, [#allocation3]  }
  0x13   :  { %s211_s28 = scalar_lea.hbm %s336_s1, 512 }
  0x14   :  { %p212_p8 = scmp.ne.s32.totalorder %s336_s1, %s211_s28  ;;  %p215_p9 = scmp.lt.u32.totalorder %s211_s28, %s336_s1 }
  0x16   :  { %p217_p10 = pnand %p215_p9, %p212_p8 }
  0x18   :  { %220 = shalt.err (!%p217_p10)
}
  0x19   :  { %s221_s6 = scalar_lea.vmem %s289_s15, 512  ;;  %p226_p12 = scmp.lt.s32.totalorder %s289_s15, %s289_s15 }
  0x1a   :  { %p222_p11 = scmp.ne.s32.totalorder %s289_s15, %s221_s6  ;;  %p227_p13 = scmp.lt.s32.totalorder %s221_s6, %s221_s6 }
  0x1c   :  { %p228_p0 = por %p227_p13, %p226_p12 }
  0x1e   :  { %p229_p1 = pnand %p228_p0, %p222_p11 }
  0x20   :  { %232 = shalt.err (!%p229_p1)
}
  0x21   :  { %s263_s0 = smov 128   ;;  %s264_s7 = smov 8  }
  0x22   :  { %32 = dma.hbm_to_vmem [thread:$0]  %s336_s1, 512, %s289_s15, [#allocation6], %s263_s0, %s263_s0, %s264_s7  }
  0x23   :  { %255 = dma.done.wait [#allocation3], 128  }
  0x24   :  { %256 = vsyncadd [#allocation3], 4294967168 }
  0x25   :  { %257 = dma.done.wait [#allocation6], 512  }
  0x26   :  { %258 = vsyncadd [#allocation6], 4294966784  ;;  %v265_v0 = vmov 0.0|0.0   ;;  %vm266_vm0 = vmmov 0   ;;  %v267_v1 = vmov 0.0   ;;  %v55_v2 = vld [vmem:[#allocation5] sm:$0xff] }
  0x27   :  { %175 = vmatprep.subr.bf16.mxu0 %v265_v0  ;;  %172 = vmatprep.mubr.msk.f32.mxu0 %vm266_vm0, %v267_v1  ;;  %v56_v3 = vld [vmem:[#allocation5 + $0x8] sm:$0xff]  ;;  %v57_v4 = vld [vmem:[#allocation5 + $0x10] sm:$0xff]  ;;  %v58_v6 = vld [vmem:[#allocation5 + $0x18] sm:$0xff]  ;;  %vm59_vm1 = vcmask 261120   ;;  %s268_s11 = smov [#allocation7]  }
  0x28   :  { %v176_v5 = vpack.c.bf16 %v56_v3, %v55_v2  ;;  %v179_v7 = vpack.c.bf16 %v58_v6, %v57_v4  ;;  %v54_v8 = vld [vmem:[#allocation2] sm:$0xff]  ;;  %s147_s12 = sshll.u32 %s268_s11, 4  ;;  %s148_s12 = int_to_ptr.vmem [resolvable:$true] %s147_s12 }
  0x29   :  { %v157_v9 = vld [vmem:[%s337_s2] ss:$0 sm:$0xff]  ;;  %s233_s13 = scalar_lea.vmem %s148_s12, 128  ;;  %p238_p3 = scmp.lt.s32.totalorder %s148_s12, %s148_s12 }
  0x2a   :  { %177 = vmatpush3.bf16.msra.mxu0 %v176_v5  ;;  %p234_p2 = scmp.ne.s32.totalorder %s148_s12, %s233_s13  ;;  %p239_p4 = scmp.lt.s32.totalorder %s233_s13, %s233_s13 }
  0x2b   :  { %178 = vmatprep.subr.bf16.mxu0 %v265_v0 }
  0x2c   :  { %p240_p5 = por %p239_p4, %p238_p3 }
  0x2e   :  { %180 = vmatpush3.bf16.msra.mxu0 %v179_v7  ;;  %p241_p6 = pnand %p240_p5, %p234_p2 }
  0x31   :  { %173 = vmatmul.mubr.msk.f32.vlgmr.msra.gmra.mrb[0].mxu0 %vm59_vm1, %v54_v8 }
 0x104   :  { %v129_v10 = vpop.f32.mrb[0].mxu0 }
 0x105   :  { %v133_v11 = vadd.f32 %v157_v9, %v129_v10  ;;  %v174_v12 = vpop.f32.mrb[1].mxu0 }
 0x107   :  { %v139_v13 = vmax.f32 %v133_v11, 0.0 }
 0x109   :  { %140 = vst [vmem:[#allocation7] sm:$0xff] %v139_v13 }
 0x10a   :  { %244 = shalt.err (!%p241_p6)
}
 0x10b   :  { %s245_s16 = scalar_lea.hbm %s338_s3, 128 }
 0x10c   :  { %p246_p7 = scmp.ne.s32.totalorder %s338_s3, %s245_s16  ;;  %p249_p8 = scmp.lt.u32.totalorder %s245_s16, %s338_s3 }
 0x10e   :  { %p251_p9 = pnand %p249_p8, %p246_p7 }
 0x110   :  { %254 = shalt.err (!%p251_p9)
}
 0x111   :  { %150 = dma.vmem_to_hbm [thread:$0]  %s148_s12, 128, %s338_s3, [#allocation4]  }
 0x112   :  { %259 = dma.done.wait [#allocation4], 128  }
 0x113   :  { %260 = vsyncadd [#allocation4], 4294967168 }
 0x114   :  { %154 = vsyncpa [#allocation3], 1 }
 0x115   :  { %155 = vsyncpa [#allocation6], 1 }
 0x116   :  { %156 = vsyncpa [#allocation4], 1 }

</bundles_post_ra>
